<compile_context>
chip_gen: v5e
topology: v5e:2x2
jax: 0.10.0
libtpu: 0.0.40
codegen_flags: <defaults>
</compile_context>

<pallas_src>
import jax
import jax.numpy as jnp
from jax.experimental import pallas as pl
from jax.experimental.pallas import tpu as pltpu


def _decoder_kernel(x_ref, enc_ref, w_ref, b_ref, out_ref):
    # enc: [TB, H]  (H lane-dense),  w: [2, H]  (H lane-dense)
    enc = enc_ref[...].astype(jnp.float32)
    w = w_ref[...].astype(jnp.float32)

    # VPU multiply + XLU lane reduction, one pass per output feature (N=2).
    y0 = jnp.sum(enc * w[0:1, :], axis=-1, keepdims=True)   # [TB, 1]
    y1 = jnp.sum(enc * w[1:2, :], axis=-1, keepdims=True)   # [TB, 1]

    # Assemble the [TB, 2] result with a lane-index select (pure VPU ops;
    # avoids narrow-lane concatenation).
    col = jax.lax.broadcasted_iota(jnp.int32, out_ref.shape, 1)  # column index
    y = jnp.where(col == 0, y0, y1)                              # [TB, 2]

    out_ref[...] = (
        y + b_ref[...].astype(jnp.float32) + x_ref[...].astype(jnp.float32)
    ).astype(out_ref.dtype)


def decoder_forward(x, encoder_output, weight, bias, *, max_block_b=512):
    """x: [B, 2], encoder_output: [B, H], weight: [2, H] (PyTorch layout), bias: [2]."""
    B, H = encoder_output.shape

    # Batch tile: full extent if small, otherwise a large multiple-of-8 tile
    # (mem-bound op -> biggest tile that comfortably fits double-buffered VMEM).
    if B <= max_block_b:
        tb = B                       # full-extent block (exempt from (8,128) rule)
    else:
        tb = (max_block_b // 8) * 8  # tiled block rows must be a multiple of 8

    grid = (pl.cdiv(B, tb),)
    b2d = bias.reshape(1, 2)

    return pl.pallas_call(
        _decoder_kernel,
        out_shape=jax.ShapeDtypeStruct((B, 2), jnp.float32),
        grid_spec=pl.GridSpec(
            grid=grid,
            in_specs=[
                pl.BlockSpec((tb, 2), lambda i: (i, 0)),   # x (residual)
                pl.BlockSpec((tb, H), lambda i: (i, 0)),   # encoder_output
                pl.BlockSpec((2, H), lambda i: (0, 0)),    # weight, lane-dense [2, H]
                pl.BlockSpec((1, 2), lambda i: (0, 0)),    # bias
            ],
            out_specs=pl.BlockSpec((tb, 2), lambda i: (i, 0)),
        ),
        compiler_params=pltpu.CompilerParams(
            # Batch tiles are independent -> shard across TensorCores (v7x megacore).
            dimension_semantics=("parallel",),
        ),
    )(x, encoder_output, weight, b2d)


if __name__ == "__main__":
    # Small shapes consistent with the module: batch=8, hidden_size=32
    B, H = 8, 32
    key = jax.random.PRNGKey(0)
    k_x, k_enc, k_w, k_b = jax.random.split(key, 4)

    x = jax.random.normal(k_x, (B, 2), dtype=jnp.float32)
    encoder_output = jax.random.normal(k_enc, (B, H), dtype=jnp.float32)

    # nn.Linear(hidden_size, 2): weight [2, H], bias [2]
    bound = 1.0 / jnp.sqrt(H)
    weight = jax.random.uniform(k_w, (2, H), minval=-bound, maxval=bound,
                                dtype=jnp.float32)
    bias = jax.random.uniform(k_b, (2,), minval=-bound, maxval=bound,
                              dtype=jnp.float32)

    out = decoder_forward(x, encoder_output, weight, bias)
    out = jax.block_until_ready(out)

    # Pure-JAX reference check
    ref = encoder_output @ weight.T + bias + x
    assert out.shape == (B, 2)
    assert jnp.allclose(out, ref, atol=1e-5, rtol=1e-5), "mismatch vs reference"

    print("KERNEL_OK")
</pallas_src>

<mosaic_0001>
module attributes {stable_mosaic.version = 11 : i64} {
  func.func @_decoder_kernel(%arg0: i32, %arg1: memref<8x2xf32, #tpu.memory_space<vmem>>, %arg2: memref<8x32xf32, #tpu.memory_space<vmem>>, %arg3: memref<2x32xf32, #tpu.memory_space<vmem>>, %arg4: memref<1x2xf32, #tpu.memory_space<vmem>>, %arg5: memref<8x2xf32, #tpu.memory_space<vmem>>) attributes {dimension_semantics = [#tpu.dimension_semantics<parallel>], iteration_bounds = array<i64: 1>, scalar_prefetch = 0 : i64, scratch_operands = 0 : i64, tpu.core_type = #tpu.core_type<tc>, window_params = [{transform_indices = @transform_0, window_bounds = array<i64: 8, 2>}, {transform_indices = @transform_1, window_bounds = array<i64: 8, 32>}, {pipeline_mode = #tpu.pipeline_mode<synchronous>, transform_indices = @transform_2, window_bounds = array<i64: 2, 32>}, {pipeline_mode = #tpu.pipeline_mode<synchronous>, transform_indices = @transform_3, window_bounds = array<i64: 1, 2>}, {transform_indices = @transform_4, window_bounds = array<i64: 8, 2>}]} {
    %c0 = arith.constant 0 : index
    %c0_0 = arith.constant 0 : index
    %0 = vector.load %arg2[%c0, %c0_0] : memref<8x32xf32, #tpu.memory_space<vmem>>, vector<8x32xf32>
    %c0_1 = arith.constant 0 : index
    %c0_2 = arith.constant 0 : index
    %1 = vector.load %arg3[%c0_1, %c0_2] : memref<2x32xf32, #tpu.memory_space<vmem>>, vector<2x32xf32>
    %2 = vector.extract_strided_slice %1 {offsets = [0, 0], sizes = [1, 32], strides = [1, 1]} : vector<2x32xf32> to vector<1x32xf32>
    %3 = vector.broadcast %2 : vector<1x32xf32> to vector<8x32xf32>
    %4 = arith.mulf %0, %3 : vector<8x32xf32>
    %cst = arith.constant dense<0.000000e+00> : vector<8xf32>
    %5 = vector.multi_reduction <add>, %4, %cst [1] : vector<8x32xf32> to vector<8xf32>
    %6 = vector.shape_cast %5 : vector<8xf32> to vector<8x1xf32>
    %7 = vector.extract_strided_slice %1 {offsets = [1, 0], sizes = [1, 32], strides = [1, 1]} : vector<2x32xf32> to vector<1x32xf32>
    %8 = vector.broadcast %7 : vector<1x32xf32> to vector<8x32xf32>
    %9 = arith.mulf %0, %8 : vector<8x32xf32>
    %cst_3 = arith.constant dense<0.000000e+00> : vector<8xf32>
    %10 = vector.multi_reduction <add>, %9, %cst_3 [1] : vector<8x32xf32> to vector<8xf32>
    %11 = vector.shape_cast %10 : vector<8xf32> to vector<8x1xf32>
    %12 = tpu.iota {dimensions = array<i32: 1>} : vector<8x2xi32>
    %c0_i32 = arith.constant 0 : i32
    %13 = vector.broadcast %c0_i32 : i32 to vector<8x2xi32>
    %14 = arith.cmpi eq, %12, %13 : vector<8x2xi32>
    %15 = vector.shape_cast %6 : vector<8x1xf32> to vector<8x1xf32>
    %16 = vector.broadcast %15 : vector<8x1xf32> to vector<8x2xf32>
    %17 = vector.shape_cast %11 : vector<8x1xf32> to vector<8x1xf32>
    %18 = vector.broadcast %17 : vector<8x1xf32> to vector<8x2xf32>
    %19 = arith.select %14, %16, %18 : vector<8x2xi1>, vector<8x2xf32>
    %c0_4 = arith.constant 0 : index
    %c0_5 = arith.constant 0 : index
    %20 = vector.load %arg4[%c0_4, %c0_5] : memref<1x2xf32, #tpu.memory_space<vmem>>, vector<1x2xf32>
    %21 = vector.broadcast %20 : vector<1x2xf32> to vector<8x2xf32>
    %22 = arith.addf %19, %21 : vector<8x2xf32>
    %c0_6 = arith.constant 0 : index
    %c0_7 = arith.constant 0 : index
    %23 = vector.load %arg1[%c0_6, %c0_7] : memref<8x2xf32, #tpu.memory_space<vmem>>, vector<8x2xf32>
    %24 = arith.addf %22, %23 : vector<8x2xf32>
    %c0_8 = arith.constant 0 : index
    %c0_9 = arith.constant 0 : index
    %25 = vector.load %arg5[%c0_8, %c0_9] : memref<8x2xf32, #tpu.memory_space<vmem>>, vector<8x2xf32>
    tpu.vector_store %arg5[%c0_8, %c0_9], %24 {strides = array<i32>} : memref<8x2xf32, #tpu.memory_space<vmem>>, vector<8x2xf32>,
    return
  }
  func.func @transform_0(%arg0: i32) -> (i32, i32) {
    %c0_i32 = arith.constant 0 : i32
    %c0_i32_0 = arith.constant 0 : i32
    return %arg0, %c0_i32 : i32, i32
  }
  func.func @transform_1(%arg0: i32) -> (i32, i32) {
    %c0_i32 = arith.constant 0 : i32
    %c0_i32_0 = arith.constant 0 : i32
    return %arg0, %c0_i32 : i32, i32
  }
  func.func @transform_2(%arg0: i32) -> (i32, i32) {
    %c0_i32 = arith.constant 0 : i32
    %c0_i32_0 = arith.constant 0 : i32
    %c0_i32_1 = arith.constant 0 : i32
    return %c0_i32, %c0_i32_0 : i32, i32
  }
  func.func @transform_3(%arg0: i32) -> (i32, i32) {
    %c0_i32 = arith.constant 0 : i32
    %c0_i32_0 = arith.constant 0 : i32
    %c0_i32_1 = arith.constant 0 : i32
    return %c0_i32, %c0_i32_0 : i32, i32
  }
  func.func @transform_4(%arg0: i32) -> (i32, i32) {
    %c0_i32 = arith.constant 0 : i32
    %c0_i32_0 = arith.constant 0 : i32
    return %arg0, %c0_i32 : i32, i32
  }
}

</mosaic_0001>

<bundles_post_ra>
// kernel: tpu_custom_call.1
= control target key start
LH: loop header
LB: loop body
LE: loop exit
PB: predicated region body
PF: predicated region fallthrough
CT: control target
= control target key end

     0   :  { %vm21_vm0 = vcmask 261120   ;;  %v30_v8 = vlaneseq  ;;  %vm41_vm2 = vcmask 15360   ;;  %s88_s1 = inlined_call_operand.vmem [shape: f32[8,32], index: 1, kind: input, shape index: {}]   ;;  %s89_s2 = inlined_call_operand.vmem [shape: f32[2,32], index: 2, kind: input, shape index: {}]   ;;  %s90_s3 = inlined_call_operand.vmem [shape: f32[1,2], index: 3, kind: input, shape index: {}]   ;;  %s91_s0 = inlined_call_operand.vmem [shape: f32[8,2], index: 0, kind: input, shape index: {}]   ;;  %s92_s4 = inlined_call_operand.vmem [shape: f32[8,2], index: 4, kind: output, shape index: {}]  }
   0x1   :  { %v17_v0 = vld [vmem:[%s88_s1] sm:$0xff] }
   0x2   :  { %v18_v1 = vld [vmem:[%s89_s2] sm:$0x3]  ;;  %v31_v10 = vand.u32 127, %v30_v8 }
   0x3   :  { %v19_v2 = vperm.slane %v18_v1, 0  ;;  %v25_v4 = vperm.slane %v18_v1, 1  ;;  %v47_v11 = vld [vmem:[%s90_s3] ss:$0 sm:$0xff] }
   0x4   :  { %vm32_vm1 = vcmp.eq.s32.totalorder %v31_v10, 0  ;;  %v39_v14 = vld [vmem:[%s91_s0] sm:$0xff] }
   0x5   :  { %v20_v3 = vmul.f32 %v19_v2, %v17_v0  ;;  %v26_v6 = vmul.f32 %v25_v4, %v17_v0 }
   0x7   :  { %v22_v5 = vsel %vm21_vm0, %v20_v3, 0.0  ;;  %v27_v7 = vsel %vm21_vm0, %v26_v6, 0.0 }
   0x8   :  { %23 = vadd.xlane.f32.xlu0 %v22_v5 }
  0x10   :  { %28 = vadd.xlane.f32.xlu0 %v27_v7 }
  0x7b   :  { %v24_v9 = vpop.xlane.xlu0 %23 }
  0x83   :  { %v29_v12 = vpop.xlane.xlu0 %28 }
  0x84   :  { %v33_v13 = vsel %vm32_vm1, %v24_v9, %v29_v12 }
  0x85   :  { %v38_v15 = vadd.f32 %v47_v11, %v33_v13 }
  0x87   :  { %v40_v16 = vadd.f32 %v39_v14, %v38_v15 }
  0x89   :  { %42 = vst.msk [vmem:[%s92_s4] sm:$0xff] %vm41_vm2, %v40_v16 }

</bundles_post_ra>
